<compile_context>
chip_gen: v5e
topology: v5e:2x2
jax: 0.10.0
libtpu: 0.0.40
codegen_flags: <defaults>
</compile_context>

<pallas_src>
import jax
import jax.numpy as jnp
from jax import lax
from jax.experimental import pallas as pl
from jax.experimental.pallas import tpu as pltpu


def _mlp_kernel(x_ref, w1_ref, b1_ref, w2_ref, b2_ref, w3_ref, b3_ref, o_ref):
    """Fused MLP forward on one batch tile.

    x arrives in its native [tb, n_in] f32 layout; the bf16 cast and the
    reorientation to feature-major [features, tb] happen here (VPU/XLU have
    slack) so the wrapper never touches x.  Matmuls are bf16 on the MXU with
    f32 accumulation; ReLU and the softmax epilogue are f32.
    """
    x = x_ref[...].astype(jnp.bfloat16)                               # [tb, n_in]
    # Layer 1: contract n_in of W1 [h1, n_in] with n_in of x [tb, n_in] -> [h1, tb]
    h = lax.dot_general(w1_ref[...], x,
                        dimension_numbers=(((1,), (1,)), ((), ())),
                        preferred_element_type=jnp.float32) + b1_ref[...]
    h = jnp.maximum(h, 0.0)
    # Layer 2: W2 @ h + b2, ReLU                                       -> [h2, tb]
    h = jnp.dot(w2_ref[...], h.astype(jnp.bfloat16),
                preferred_element_type=jnp.float32) + b2_ref[...]
    h = jnp.maximum(h, 0.0)
    # Output layer: W3 @ h + b3                                        -> [n_out, tb]
    logits = jnp.dot(w3_ref[...], h.astype(jnp.bfloat16),
                     preferred_element_type=jnp.float32) + b3_ref[...]
    # Softmax over the feature axis (axis 0 in this layout == dim=1 of the
    # original [batch, features] layout used by nn.Softmax in the module).
    m = jnp.max(logits, axis=0, keepdims=True)
    e = jnp.exp(logits - m)
    denom = jnp.sum(e, axis=0, keepdims=True)
    o_ref[...] = e * pl.reciprocal(denom, approx=True)


def _round_up(x, m):
    return -(-x // m) * m


def _choose_batch_tile(B, cap=4096):
    """Pick the batch (lane) tile width.

    * B < 256: one full-extent block (a tile that isn't a multiple of 128 is
      only legal when it covers the whole batch).
    * B >= 256: at least 2 grid steps (so the x-tile DMA overlaps compute and
      v7x can shard the "parallel" axis across its 2 TensorCores), tile a
      multiple of 128, capped at `cap` columns.  At cap=4096 the per-step
      working set (double-buffered x/out tiles + f32 intermediates) is a few
      MiB — safely under the scoped-VMEM defaults on v5e/v6e/v7x — while each
      step moves enough bytes to amortize the ~0.35 us fixed step overhead.
    * Prefer an even grid length so v7x's two cores get balanced work.
    """
    if B < 256:
        return B
    tb = min(cap, _round_up(-(-B // 2), 128))
    g = -(-B // tb)
    if g > 2 and g % 2:                      # odd grid > 2: shrink tile to even it out
        tb2 = _round_up(-(-B // (g + 1)), 128)
        if tb2 >= 128 and (-(-B // tb2)) % 2 == 0:
            tb = tb2
    return tb


def _xla_forward(x, w1, b1, w2, b2, w3, b3):
    """Small-batch fast path: plain fused XLA ops beat a kernel launch at tiny B."""
    h = jnp.maximum(x @ w1.T + b1, 0.0)
    h = jnp.maximum(h @ w2.T + b2, 0.0)
    return jax.nn.softmax(h @ w3.T + b3, axis=-1)


def mlp_forward(x, w1, b1, w2, b2, w3, b3, *, batch_tile=None, force_pallas=False,
                feature_major_out=False):
    """x: [B, n_in] f32.  Weights in PyTorch orientation [out, in]; biases [out].

    Returns [B, n_out] probabilities (module semantics).  Set
    feature_major_out=True to get the kernel's native [n_out, B] layout and
    skip the wrapper-side output transpose (saves an extra HBM pass).
    """
    B, n_in = x.shape
    h1, h2, n_out = w1.shape[0], w2.shape[0], w3.shape[0]

    # Small-batch fast path (pallas_call fixed overhead dominates below ~256).
    if not force_pallas and batch_tile is None and B < 256:
        out = _xla_forward(x, w1, b1, w2, b2, w3, b3)
        return out.T if feature_major_out else out

    x = x.astype(jnp.float32)
    tb = _choose_batch_tile(B) if batch_tile is None else batch_tile
    grid = (pl.cdiv(B, tb),)

    # bf16 weights for the MXU; biases stay f32, shaped [out, 1] so they
    # broadcast over the batch (lane) axis inside the kernel.
    w1b = w1.astype(jnp.bfloat16)
    w2b = w2.astype(jnp.bfloat16)
    w3b = w3.astype(jnp.bfloat16)
    b1c = b1.reshape(h1, 1).astype(jnp.float32)
    b2c = b2.reshape(h2, 1).astype(jnp.float32)
    b3c = b3.reshape(n_out, 1).astype(jnp.float32)

    # Constant operands: fetched once, so single-buffer them (free VMEM headroom).
    def _const_spec(shape):
        return pl.BlockSpec(shape, lambda i: (0, 0), pipeline_mode=pl.Buffered(1))

    flops = 2 * B * (n_in * h1 + h1 * h2 + h2 * n_out)
    bytes_accessed = (
        B * n_in * 4                                   # x (f32, native layout)
        + (w1b.size + w2b.size + w3b.size) * 2         # weights (bf16)
        + (b1c.size + b2c.size + b3c.size) * 4         # biases (f32)
        + B * n_out * 4                                # output (f32)
    )

    out_t = pl.pallas_call(
        _mlp_kernel,
        out_shape=jax.ShapeDtypeStruct((n_out, B), jnp.float32),
        grid=grid,
        in_specs=[
            # x in its native [B, n_in] layout, tiled over batch.
            pl.BlockSpec((tb, n_in), lambda i: (i, 0)),
            _const_spec((h1, n_in)),      # W1  — resident
            _const_spec((h1, 1)),         # b1
            _const_spec((h2, h1)),        # W2
            _const_spec((h2, 1)),         # b2
            _const_spec((n_out, h2)),     # W3
            _const_spec((n_out, 1)),      # b3
        ],
        out_specs=pl.BlockSpec((n_out, tb), lambda i: (0, i)),   # lane-dense stores
        compiler_params=pltpu.CompilerParams(
            dimension_semantics=("parallel",),
        ),
        cost_estimate=pl.CostEstimate(
            flops=flops,
            transcendentals=B * (n_out + 1),   # exp per logit + per-column reciprocal
            bytes_accessed=bytes_accessed,
        ),
    )(x, w1b, b1c, w2b, b2c, w3b, b3c)

    return out_t if feature_major_out else out_t.T                   # [B, n_out]


def init_params(key, n_env_inputs, n_per_hidden, n_action_space):
    """Deterministic init mimicking nn.Linear's U(-1/sqrt(fan_in), 1/sqrt(fan_in)).

    Weights are in PyTorch orientation [out_features, in_features]; biases [out]."""
    layer_counts = [n_env_inputs] + list(n_per_hidden) + [n_action_space]
    params = []
    for i in range(len(layer_counts) - 1):
        fan_in, fan_out = layer_counts[i], layer_counts[i + 1]
        key, kw, kb = jax.random.split(key, 3)
        bound = 1.0 / (fan_in ** 0.5)
        w = jax.random.uniform(kw, (fan_out, fan_in), jnp.float32, -bound, bound)
        b = jax.random.uniform(kb, (fan_out,), jnp.float32, -bound, bound)
        params.append((w, b))
    return params


def reference_forward(x, params):
    h = x
    for i, (w, b) in enumerate(params):
        h = h @ w.T + b
        if i < len(params) - 1:
            h = jnp.maximum(h, 0.0)
    return jax.nn.softmax(h, axis=-1)


if __name__ == "__main__":
    # Shapes consistent with the module's forward:
    # MultiLayerModel(n_env_inputs=32, n_action_space=16, n_per_hidden=[64, 32])
    n_env_inputs = 32
    n_per_hidden = [64, 32]
    n_action_space = 16

    key = jax.random.PRNGKey(0)
    key, kp = jax.random.split(key)
    params = init_params(kp, n_env_inputs, n_per_hidden, n_action_space)
    (w1, b1), (w2, b2), (w3, b3) = params

    # 1) Tiny batch, forced through the Pallas kernel (single full-extent tile).
    key, kx = jax.random.split(key)
    x_small = jax.random.normal(kx, (8, n_env_inputs), jnp.float32)
    out_small = jax.block_until_ready(
        mlp_forward(x_small, w1, b1, w2, b2, w3, b3, force_pallas=True))
    ref_small = reference_forward(x_small, params)
    assert out_small.shape == (8, n_action_space)
    # bf16 matmuls + approx reciprocal -> tolerance looser than pure-f32;
    # outputs are probabilities in [0, 1], so absolute tolerance is meaningful.
    err_small = float(jnp.max(jnp.abs(out_small - ref_small)))
    assert jnp.allclose(out_small, ref_small, atol=2.5e-2, rtol=0.0), err_small
    assert jnp.allclose(jnp.sum(out_small, axis=-1), 1.0, atol=5e-3)

    # 2) Larger batch exercising the tiled "parallel" grid (tb=256, grid=(2,)).
    key, kx2 = jax.random.split(key)
    x_big = jax.random.normal(kx2, (512, n_env_inputs), jnp.float32)
    out_big = jax.block_until_ready(mlp_forward(x_big, w1, b1, w2, b2, w3, b3))
    ref_big = reference_forward(x_big, params)
    assert out_big.shape == (512, n_action_space)
    err_big = float(jnp.max(jnp.abs(out_big - ref_big)))
    assert jnp.allclose(out_big, ref_big, atol=2.5e-2, rtol=0.0), err_big
    assert jnp.allclose(jnp.sum(out_big, axis=-1), 1.0, atol=5e-3)

    print("KERNEL_OK")
</pallas_src>

<mosaic_0001>
module attributes {stable_mosaic.version = 11 : i64} {
  func.func @_mlp_kernel(%arg0: i32, %arg1: memref<8x32xf32, #tpu.memory_space<vmem>>, %arg2: memref<64x32xbf16, #tpu.memory_space<vmem>>, %arg3: memref<64x1xf32, #tpu.memory_space<vmem>>, %arg4: memref<32x64xbf16, #tpu.memory_space<vmem>>, %arg5: memref<32x1xf32, #tpu.memory_space<vmem>>, %arg6: memref<16x32xbf16, #tpu.memory_space<vmem>>, %arg7: memref<16x1xf32, #tpu.memory_space<vmem>>, %arg8: memref<16x8xf32, #tpu.memory_space<vmem>>) attributes {dimension_semantics = [#tpu.dimension_semantics<parallel>], iteration_bounds = array<i64: 1>, scalar_prefetch = 0 : i64, scratch_operands = 0 : i64, tpu.core_type = #tpu.core_type<tc>, window_params = [{transform_indices = @transform_0, window_bounds = array<i64: 8, 32>}, {pipeline_mode = #tpu.pipeline_mode<synchronous>, transform_indices = @transform_1, window_bounds = array<i64: 64, 32>}, {pipeline_mode = #tpu.pipeline_mode<synchronous>, transform_indices = @transform_2, window_bounds = array<i64: 64, 1>}, {pipeline_mode = #tpu.pipeline_mode<synchronous>, transform_indices = @transform_3, window_bounds = array<i64: 32, 64>}, {pipeline_mode = #tpu.pipeline_mode<synchronous>, transform_indices = @transform_4, window_bounds = array<i64: 32, 1>}, {pipeline_mode = #tpu.pipeline_mode<synchronous>, transform_indices = @transform_5, window_bounds = array<i64: 16, 32>}, {pipeline_mode = #tpu.pipeline_mode<synchronous>, transform_indices = @transform_6, window_bounds = array<i64: 16, 1>}, {transform_indices = @transform_7, window_bounds = array<i64: 16, 8>}]} {
    %c0 = arith.constant 0 : index
    %c0_0 = arith.constant 0 : index
    %0 = vector.load %arg1[%c0, %c0_0] : memref<8x32xf32, #tpu.memory_space<vmem>>, vector<8x32xf32>
    %1 = arith.truncf %0 : vector<8x32xf32> to vector<8x32xbf16>
    %c0_1 = arith.constant 0 : index
    %c0_2 = arith.constant 0 : index
    %2 = vector.load %arg2[%c0_1, %c0_2] : memref<64x32xbf16, #tpu.memory_space<vmem>>, vector<64x32xbf16>
    %cst = arith.constant dense<0.000000e+00> : vector<64x8xf32>
    %3 = tpu.matmul %2, %1, %cst {dimension_numbers = #tpu.dot_dimension_numbers<[1], [1], [0], [0], [0, 0, 1, 0], [], []>} : vector<64x32xbf16>, vector<8x32xbf16>, vector<64x8xf32> -> vector<64x8xf32>
    %c0_3 = arith.constant 0 : index
    %c0_4 = arith.constant 0 : index
    %4 = vector.load %arg3[%c0_3, %c0_4] : memref<64x1xf32, #tpu.memory_space<vmem>>, vector<64x1xf32>
    %5 = vector.broadcast %4 : vector<64x1xf32> to vector<64x8xf32>
    %6 = arith.addf %3, %5 : vector<64x8xf32>
    %cst_5 = arith.constant 0.000000e+00 : f32
    %7 = vector.broadcast %cst_5 : f32 to vector<64x8xf32>
    %8 = arith.maximumf %6, %7 : vector<64x8xf32>
    %c0_6 = arith.constant 0 : index
    %c0_7 = arith.constant 0 : index
    %9 = vector.load %arg4[%c0_6, %c0_7] : memref<32x64xbf16, #tpu.memory_space<vmem>>, vector<32x64xbf16>
    %10 = arith.truncf %8 : vector<64x8xf32> to vector<64x8xbf16>
    %cst_8 = arith.constant dense<0.000000e+00> : vector<32x8xf32>
    %11 = tpu.matmul %9, %10, %cst_8 {dimension_numbers = #tpu.dot_dimension_numbers<[1], [0], [0], [1], [0, 0, 1, 1], [], []>} : vector<32x64xbf16>, vector<64x8xbf16>, vector<32x8xf32> -> vector<32x8xf32>
    %c0_9 = arith.constant 0 : index
    %c0_10 = arith.constant 0 : index
    %12 = vector.load %arg5[%c0_9, %c0_10] : memref<32x1xf32, #tpu.memory_space<vmem>>, vector<32x1xf32>
    %13 = vector.broadcast %12 : vector<32x1xf32> to vector<32x8xf32>
    %14 = arith.addf %11, %13 : vector<32x8xf32>
    %cst_11 = arith.constant 0.000000e+00 : f32
    %15 = vector.broadcast %cst_11 : f32 to vector<32x8xf32>
    %16 = arith.maximumf %14, %15 : vector<32x8xf32>
    %c0_12 = arith.constant 0 : index
    %c0_13 = arith.constant 0 : index
    %17 = vector.load %arg6[%c0_12, %c0_13] : memref<16x32xbf16, #tpu.memory_space<vmem>>, vector<16x32xbf16>
    %18 = arith.truncf %16 : vector<32x8xf32> to vector<32x8xbf16>
    %cst_14 = arith.constant dense<0.000000e+00> : vector<16x8xf32>
    %19 = tpu.matmul %17, %18, %cst_14 {dimension_numbers = #tpu.dot_dimension_numbers<[1], [0], [0], [1], [0, 0, 1, 1], [], []>} : vector<16x32xbf16>, vector<32x8xbf16>, vector<16x8xf32> -> vector<16x8xf32>
    %c0_15 = arith.constant 0 : index
    %c0_16 = arith.constant 0 : index
    %20 = vector.load %arg7[%c0_15, %c0_16] : memref<16x1xf32, #tpu.memory_space<vmem>>, vector<16x1xf32>
    %21 = vector.broadcast %20 : vector<16x1xf32> to vector<16x8xf32>
    %22 = arith.addf %19, %21 : vector<16x8xf32>
    %cst_17 = arith.constant dense<0xFF800000> : vector<8xf32>
    %23 = vector.multi_reduction <maximumf>, %22, %cst_17 [0] : vector<16x8xf32> to vector<8xf32>
    %24 = vector.shape_cast %23 : vector<8xf32> to vector<1x8xf32>
    %25 = vector.broadcast %24 : vector<1x8xf32> to vector<16x8xf32>
    %26 = arith.subf %22, %25 : vector<16x8xf32>
    %27 = math.exp %26 : vector<16x8xf32>
    %cst_18 = arith.constant dense<0.000000e+00> : vector<8xf32>
    %28 = vector.multi_reduction <add>, %27, %cst_18 [0] : vector<16x8xf32> to vector<8xf32>
    %29 = vector.shape_cast %28 : vector<8xf32> to vector<1x8xf32>
    %30 = tpu.reciprocal %29 {approx = true} : vector<1x8xf32> -> vector<1x8xf32>
    %31 = vector.broadcast %30 : vector<1x8xf32> to vector<16x8xf32>
    %32 = arith.mulf %27, %31 : vector<16x8xf32>
    %c0_19 = arith.constant 0 : index
    %c0_20 = arith.constant 0 : index
    %33 = vector.load %arg8[%c0_19, %c0_20] : memref<16x8xf32, #tpu.memory_space<vmem>>, vector<16x8xf32>
    tpu.vector_store %arg8[%c0_19, %c0_20], %32 {strides = array<i32>} : memref<16x8xf32, #tpu.memory_space<vmem>>, vector<16x8xf32>,
    return
  }
  func.func @transform_0(%arg0: i32) -> (i32, i32) {
    %c0_i32 = arith.constant 0 : i32
    %c0_i32_0 = arith.constant 0 : i32
    return %arg0, %c0_i32 : i32, i32
  }
  func.func @transform_1(%arg0: i32) -> (i32, i32) {
    %c0_i32 = arith.constant 0 : i32
    %c0_i32_0 = arith.constant 0 : i32
    %c0_i32_1 = arith.constant 0 : i32
    return %c0_i32, %c0_i32_0 : i32, i32
  }
  func.func @transform_2(%arg0: i32) -> (i32, i32) {
    %c0_i32 = arith.constant 0 : i32
    %c0_i32_0 = arith.constant 0 : i32
    %c0_i32_1 = arith.constant 0 : i32
    return %c0_i32, %c0_i32_0 : i32, i32
  }
  func.func @transform_3(%arg0: i32) -> (i32, i32) {
    %c0_i32 = arith.constant 0 : i32
    %c0_i32_0 = arith.constant 0 : i32
    %c0_i32_1 = arith.constant 0 : i32
    return %c0_i32, %c0_i32_0 : i32, i32
  }
  func.func @transform_4(%arg0: i32) -> (i32, i32) {
    %c0_i32 = arith.constant 0 : i32
    %c0_i32_0 = arith.constant 0 : i32
    %c0_i32_1 = arith.constant 0 : i32
    return %c0_i32, %c0_i32_0 : i32, i32
  }
  func.func @transform_5(%arg0: i32) -> (i32, i32) {
    %c0_i32 = arith.constant 0 : i32
    %c0_i32_0 = arith.constant 0 : i32
    %c0_i32_1 = arith.constant 0 : i32
    return %c0_i32, %c0_i32_0 : i32, i32
  }
  func.func @transform_6(%arg0: i32) -> (i32, i32) {
    %c0_i32 = arith.constant 0 : i32
    %c0_i32_0 = arith.constant 0 : i32
    %c0_i32_1 = arith.constant 0 : i32
    return %c0_i32, %c0_i32_0 : i32, i32
  }
  func.func @transform_7(%arg0: i32) -> (i32, i32) {
    %c0_i32 = arith.constant 0 : i32
    %c0_i32_0 = arith.constant 0 : i32
    return %c0_i32, %arg0 : i32, i32
  }
}

</mosaic_0001>

<bundles_post_ra>
// kernel: tpu_custom_call.1
= control target key start
LH: loop header
LB: loop body
LE: loop exit
PB: predicated region body
PF: predicated region fallthrough
CT: control target
= control target key end

     0   :  { %vm105_vm0 = vcmask 261120   ;;  %v355_v1 = vmov 0   ;;  %vm200_vm1 = vcmask 523264   ;;  %vm268_vm2 = vcmask 64512   ;;  %s480_s0 = inlined_call_operand.vmem [shape: f32[8,32], index: 0, kind: input, shape index: {}]   ;;  %s481_s2 = inlined_call_operand.vmem [shape: f32[64,1], index: 2, kind: input, shape index: {}]   ;;  %s482_s1 = inlined_call_operand.vmem [shape: bf16[64,32], index: 1, kind: input, shape index: {}]   ;;  %s483_s4 = inlined_call_operand.vmem [shape: f32[32,1], index: 4, kind: input, shape index: {}]   ;;  %s484_s6 = inlined_call_operand.vmem [shape: f32[16,1], index: 6, kind: input, shape index: {}]   ;;  %s485_s3 = inlined_call_operand.vmem [shape: bf16[32,64], index: 3, kind: input, shape index: {}]   ;;  %s486_s5 = inlined_call_operand.vmem [shape: bf16[16,32], index: 5, kind: input, shape index: {}]   ;;  %s487_s7 = inlined_call_operand.vmem [shape: f32[16,8], index: 7, kind: output, shape index: {}]  }
   0x1   :  { %v27_v0 = vld [vmem:[%s480_s0] sm:$0xff]  ;;  %346 = vset.pattern.permute.xlu0 %v355_v1  ;;  %v43_v2 = vld [vmem:[%s481_s2 + $0x30] sm:$0xff]  ;;  %347 = vset.pattern.permute.xlu1 %v355_v1  ;;  %v44_v7 = vld [vmem:[%s481_s2 + $0x38] sm:$0xff] }
   0x2   :  { %v28_v3 = vpack.c.bf16 %v27_v0, %v27_v0  ;;  %77 = vperm.xlu0 %346, %v43_v2   ;;  %v41_v4 = vld [vmem:[%s481_s2 + $0x20] sm:$0xff]  ;;  %348 = vset.pattern.permute.xlu2 %v355_v1  ;;  %v39_v6 = vld [vmem:[%s481_s2 + $0x10] sm:$0xff]  ;;  %v42_v10 = vld [vmem:[%s481_s2 + $0x28] sm:$0xff] }
   0x3   :  { %67 = vperm.xlu1 %347, %v41_v4   ;;  %57 = vperm.xlu2 %348, %v39_v6   ;;  %v339_v8 = vld [vmem:[%s482_s1 + $0x10] sm:$0xff]  ;;  %v337_v9 = vld [vmem:[%s482_s1] sm:$0xff]  ;;  %v40_v11 = vld [vmem:[%s481_s2 + $0x18] sm:$0xff] }
   0x4   :  { %v119_v5 = vsel %vm105_vm0, %v28_v3, 0  ;;  %v37_v12 = vld [vmem:[%s481_s2] sm:$0xff]  ;;  %v38_v13 = vld [vmem:[%s481_s2 + $0x8] sm:$0xff]  ;;  %v168_v14 = vld [vmem:[%s483_s4 + $0x10] sm:$0xff] }
   0x5   :  { %344 = vmatpush.bf16.xpose.msra.mxu3 %v119_v5  ;;  %128 = vmatpush.bf16.xpose.msra.mxu0 %v119_v5  ;;  %v169_v15 = vld [vmem:[%s483_s4 + $0x18] sm:$0xff]  ;;  %v338_v17 = vld [vmem:[%s482_s1 + $0x8] sm:$0xff]  ;;  %v166_v18 = vld [vmem:[%s483_s4] sm:$0xff] }
   0x6   :  { %v340_v16 = vld [vmem:[%s482_s1 + $0x18] sm:$0xff]  ;;  %v167_v19 = vld [vmem:[%s483_s4 + $0x8] sm:$0xff]  ;;  %v234_v20 = vld [vmem:[%s484_s6] sm:$0xff] }
   0x7   :  { %v235_v21 = vld [vmem:[%s484_s6 + $0x8] sm:$0xff]  ;;  %v341_v58 = vld [vmem:[%s485_s3] sm:$0xff] }
   0x8   :  { %v342_v59 = vld [vmem:[%s485_s3 + $0x8] sm:$0xff] }
   0xa   :  { %82 = vperm.xlu0 %346, %v44_v7  }
   0xb   :  { %72 = vperm.xlu1 %347, %v42_v10   ;;  %62 = vperm.xlu2 %348, %v40_v11  }
   0xc   :  { %320 = vmatmul.msk.bf16.vlgmr.msra.gmra.mxu3 %vm105_vm0, %v339_v8  ;;  %318 = vmatmul.msk.bf16.vlgmr.msra.gmra.mxu0 %vm105_vm0, %v337_v9 }
  0x12   :  { %47 = vperm.xlu0 %346, %v37_v12  }
  0x13   :  { %52 = vperm.xlu1 %347, %v38_v13   ;;  %182 = vperm.xlu2 %348, %v168_v14   ;;  %v343_v14 = vld [vmem:[%s486_s5] sm:$0xff] }
  0x1a   :  { %187 = vperm.xlu0 %346, %v169_v15  }
  0x1b   :  { %172 = vperm.xlu1 %347, %v166_v18   ;;  %177 = vperm.xlu2 %348, %v167_v19  }
  0x1c   :  { %321 = vmatmul.msk.bf16.gmra.mxu3 %vm105_vm0, %v340_v16  ;;  %319 = vmatmul.msk.bf16.gmra.mxu0 %vm105_vm0, %v338_v17 }
  0x22   :  { %238 = vperm.xlu0 %346, %v234_v20  }
  0x23   :  { %243 = vperm.xlu1 %347, %v235_v21  }
  0x5d   :  { %v58_v30 = vpop.permute.xlu2 %57 }
  0x65   :  { %v63_v41 = vpop.permute.xlu2 %62 }
  0x6d   :  { %v183_v62 = vpop.permute.xlu2 %182 }
  0x74   :  { %v78_v26 = vpop.permute.xlu0 %77 }
  0x75   :  { %v68_v27 = vpop.permute.xlu1 %67  ;;  %v178_v0 = vpop.permute.xlu2 %177 }
  0x7c   :  { %v83_v31 = vpop.permute.xlu0 %82 }
  0x7d   :  { %v73_v32 = vpop.permute.xlu1 %72 }
  0x84   :  { %v48_v46 = vpop.permute.xlu0 %47 }
  0x85   :  { %v53_v49 = vpop.permute.xlu1 %52 }
  0x89   :  { %v130_v22 = vpop.f32.mrf.mxu0 }
  0x8a   :  { %v131_v48 = vadd.f32 %v130_v22, %v48_v46 }
  0x8c   :  { %v150_v54 = vmax.f32 %v131_v48, 0.0  ;;  %v188_v2 = vpop.permute.xlu0 %187 }
  0x8d   :  { %v173_v6 = vpop.permute.xlu1 %172 }
  0x8f   :  { %v140_v23 = vpop.f32.mrf.mxu3 }
  0x90   :  { %v141_v38 = vadd.f32 %v140_v23, %v68_v27 }
  0x91   :  { %v132_v24 = vpop.f32.mrf.mxu0 }
  0x92   :  { %v154_v47 = vmax.f32 %v141_v38, 0.0  ;;  %v133_v50 = vadd.f32 %v132_v24, %v53_v49 }
  0x94   :  { %v151_v55 = vmax.f32 %v133_v50, 0.0  ;;  %v239_v16 = vpop.permute.xlu0 %238 }
  0x95   :  { %v244_v18 = vpop.permute.xlu1 %243 }
  0x96   :  { %v162_v57 = vpack.c.bf16 %v151_v55, %v150_v54 }
  0x97   :  { %v142_v25 = vpop.f32.mrf.mxu3 }
  0x98   :  { %v143_v35 = vadd.f32 %v142_v25, %v73_v32 }
  0x99   :  { %v135_v28 = vpop.f32.mrf.mxu0 }
  0x9a   :  { %v155_v42 = vmax.f32 %v143_v35, 0.0  ;;  %v136_v43 = vadd.f32 %v135_v28, %v58_v30 }
  0x9c   :  { %v152_v51 = vmax.f32 %v136_v43, 0.0  ;;  %v164_v53 = vpack.c.bf16 %v155_v42, %v154_v47 }
  0x9f   :  { %v145_v29 = vpop.f32.mrf.mxu3 }
  0xa0   :  { %v146_v33 = vadd.f32 %v145_v29, %v78_v26 }
  0xa1   :  { %v137_v37 = vpop.f32.mrf.mxu0 }
  0xa2   :  { %v156_v39 = vmax.f32 %v146_v33, 0.0  ;;  %v138_v44 = vadd.f32 %v137_v37, %v63_v41 }
  0xa4   :  { %v153_v52 = vmax.f32 %v138_v44, 0.0 }
  0xa6   :  { %v163_v56 = vpack.c.bf16 %v153_v52, %v152_v51 }
  0xa7   :  { %v147_v34 = vpop.f32.mrf.mxu3 }
  0xa8   :  { %v148_v36 = vadd.f32 %v147_v34, %v83_v31 }
  0xaa   :  { %v157_v40 = vmax.f32 %v148_v36, 0.0 }
  0xac   :  { %v165_v45 = vpack.c.bf16 %v157_v40, %v156_v39 }
  0xae   :  { %211 = vmatpush.bf16.msra.mxu1 %v165_v45 }
  0xb2   :  { %212 = vmatpush.bf16.msra.mxu1 %v164_v53 }
  0xb6   :  { %213 = vmatpush.bf16.msra.mxu1 %v163_v56 }
  0xba   :  { %214 = vmatpush.bf16.msra.mxu1 %v162_v57 }
  0xbd   :  { %330 = vmatmul.msk.bf16.vlgmr.msra.gmra.mxu1 %vm200_vm1, %v341_v58 }
  0xcd   :  { %331 = vmatmul.msk.bf16.gmra.mxu1 %vm200_vm1, %v342_v59 }
 0x13a   :  { %v216_v60 = vpop.f32.mrf.mxu1 }
 0x13b   :  { %v217_v7 = vadd.f32 %v216_v60, %v173_v6 }
 0x13d   :  { %v226_v12 = vmax.f32 %v217_v7, 0.0 }
 0x142   :  { %v218_v61 = vpop.f32.mrf.mxu1 }
 0x143   :  { %v219_v4 = vadd.f32 %v218_v61, %v178_v0 }
 0x145   :  { %v227_v10 = vmax.f32 %v219_v4, 0.0 }
 0x147   :  { %v232_v13 = vpack.c.bf16 %v227_v10, %v226_v12 }
 0x14a   :  { %v221_v63 = vpop.f32.mrf.mxu1 }
 0x14b   :  { %v222_v1 = vadd.f32 %v221_v63, %v183_v62 }
 0x14d   :  { %v228_v8 = vmax.f32 %v222_v1, 0.0 }
 0x152   :  { %v223_v3 = vpop.f32.mrf.mxu1 }
 0x153   :  { %v224_v5 = vadd.f32 %v223_v3, %v188_v2 }
 0x155   :  { %v229_v9 = vmax.f32 %v224_v5, 0.0 }
 0x157   :  { %v233_v11 = vpack.c.bf16 %v229_v9, %v228_v8 }
 0x159   :  { %260 = vmatpush.bf16.msra.mxu2 %v233_v11 }
 0x15d   :  { %261 = vmatpush.bf16.msra.mxu2 %v232_v13 }
 0x160   :  { %336 = vmatmul.msk.bf16.vlgmr.msra.gmra.mxu2 %vm105_vm0, %v343_v14 }
 0x1e3   :  { %v263_v15 = vpop.f32.mrf.mxu2 }
 0x1e4   :  { %v264_v17 = vadd.f32 %v263_v15, %v239_v16 }
 0x1e6   :  { %v269_v21 = vsel %vm268_vm2, %v264_v17, -inf }
 0x1eb   :  { %v265_v19 = vpop.f32.mrf.mxu2 }
 0x1ec   :  { %v266_v20 = vadd.f32 %v265_v19, %v244_v18 }
 0x1ee   :  { %v270_v22 = vsel %vm268_vm2, %v266_v20, -inf }
 0x1ef   :  { %v271_v23 = vmax.f32 %v269_v21, %v270_v22 }
 0x1f1   :  { %v272_v24 = vrot.slane %v271_v23, 4 }
 0x1f3   :  { %v273_v25 = vmax.f32 %v271_v23, %v272_v24 }
 0x1f5   :  { %v274_v26 = vrot.slane %v273_v25, 2 }
 0x1f7   :  { %v275_v27 = vmax.f32 %v273_v25, %v274_v26 }
 0x1f9   :  { %v276_v28 = vrot.slane %v275_v27, 1 }
 0x1fb   :  { %v277_v29 = vmax.f32 %v275_v27, %v276_v28 }
 0x1fd   :  { %v278_v30 = vsub.f32 %v264_v17, %v277_v29  ;;  %v279_v31 = vsub.f32 %v266_v20, %v277_v29 }
 0x1ff   :  { %v280_v32 = vmul.f32 1.442695, %v278_v30  ;;  %v282_v33 = vmul.f32 1.442695, %v279_v31 }
 0x201   :  { %349 = vpow2.f32 %v280_v32 }
 0x202   :  { %351 = vpow2.f32 %v282_v33 }
 0x207   :  { %v350_v34 = vpop.eup %349 }
 0x208   :  { %v352_v35 = vpop.eup %351  ;;  %v284_v36 = vsel %vm268_vm2, %v350_v34, 0.0 }
 0x209   :  { %v285_v37 = vsel %vm268_vm2, %v352_v35, 0.0 }
 0x20a   :  { %v286_v38 = vadd.f32 %v285_v37, %v284_v36 }
 0x20c   :  { %v287_v39 = vrot.slane %v286_v38, 4 }
 0x20e   :  { %v288_v40 = vadd.f32 %v287_v39, %v286_v38 }
 0x210   :  { %v289_v41 = vrot.slane %v288_v40, 2 }
 0x212   :  { %v290_v42 = vadd.f32 %v289_v41, %v288_v40 }
 0x214   :  { %v291_v43 = vrot.slane %v290_v42, 1 }
 0x216   :  { %v292_v44 = vadd.f32 %v291_v43, %v290_v42 }
 0x218   :  { %353 = vrcp.f32 %v292_v44 }
 0x21e   :  { %v354_v45 = vpop.eup %353 }
 0x21f   :  { %v294_v46 = vmul.f32 %v354_v45, %v350_v34  ;;  %v295_v47 = vmul.f32 %v354_v45, %v352_v35 }
 0x221   :  { %296 = vst.msk [vmem:[%s487_s7] sm:$0xff] %vm268_vm2, %v294_v46 }
 0x222   :  { %297 = vst.msk [vmem:[%s487_s7 + $0x8] sm:$0xff] %vm268_vm2, %v295_v47 }

</bundles_post_ra>
